<compile_context>
chip_gen: v5e
topology: v5e:2x2
jax: 0.10.0
libtpu: 0.0.40
codegen_flags: <defaults>
</compile_context>

<pallas_src>
import jax
import jax.numpy as jnp
from jax.experimental import pallas as pl
from jax.experimental.pallas import tpu as pltpu

LANES = 128
TARGET_BLOCK_BYTES = 4 << 20      # ~4 MiB blocks on the main path
RAGGED_CHUNK = 32768              # elements per block on the rare ragged path
                                  # (keeps the sublane-padded VMEM buffer ~1 MiB)
_INV_SQRT2 = 0.7071067811865476


def _gelu_v1_kernel(x_ref, o_ref):
    # Exact (erf-based) GELU, matching torch.nn.functional.gelu default.
    # f32 math; on v5e/v6e f32 inputs stay DMA-bound. (erf is a VPU polynomial;
    # for bf16 activations on v6e/v7x the 'v2' variant is the roofline-friendly
    # choice.)
    x = x_ref[...].astype(jnp.float32)
    o_ref[...] = (0.5 * x * (1.0 + jax.lax.erf(x * jnp.float32(_INV_SQRT2)))
                  ).astype(o_ref.dtype)


def _gelu_v2_kernel(x_ref, o_ref):
    # x * sigmoid(1.702 x), with sigmoid written via tanh so the transcendental
    # lands on the EUP (separate VLIW slot -> essentially free under the DMA).
    # sigmoid(z) == 0.5 * (1 + tanh(z / 2)), z = 1.702 * x.
    x = x_ref[...].astype(jnp.float32)
    sig = 0.5 * (jnp.tanh(jnp.float32(0.851) * x) + 1.0)
    o_ref[...] = (x * sig).astype(o_ref.dtype)


def _block_rows(dtype, rows, lane_width):
    """Dtype-aware block height (second-to-last dim), ~4 MiB per block.

    Guarantees >= 2 grid steps whenever the sublane count allows it, so that
    dimension_semantics=("parallel",) can shard the loop across v7x's 2 TCs.
    """
    itemsize = jnp.dtype(dtype).itemsize
    # sublane packing: 8 rows for 32-bit, 16 for bf16, 32 for int8/fp8
    packing = max(8, (4 // itemsize) * 8)
    target = max(packing, TARGET_BLOCK_BYTES // (lane_width * itemsize))
    target = (target // packing) * packing
    if rows > target:
        return target
    if rows >= 2 * packing:
        # Whole array would fit one block; split into (at least) 2 for v7x.
        half = -(-rows // 2)                       # ceil(rows / 2)
        return -(-half // packing) * packing       # round up to packing
    return rows  # single full-extent block (always a legal block shape)


def _pick_lane_width(total):
    for c in (1024, 512, 256, 128):
        if total % c == 0:
            return c
    return None


def gelu_pallas(x, version="v1"):
    assert version in ("v1", "v2")
    kernel = _gelu_v1_kernel if version == "v1" else _gelu_v2_kernel
    orig_shape = x.shape
    dtype = x.dtype
    total = x.size

    compiler_params = pltpu.CompilerParams(
        dimension_semantics=("parallel",),      # v7x: shard grid across 2 TCs
        vmem_limit_bytes=32 * 1024 * 1024,      # fits 4 MiB tiles on v5e too
    )

    lane_width = _pick_lane_width(total)

    if lane_width is not None:
        # ---- main (copy-free) path: (rows, lane_width) with ~4 MiB blocks ----
        rows = total // lane_width
        x2d = jnp.reshape(x, (rows, lane_width))
        rpt = _block_rows(dtype, rows, lane_width)
        grid = (pl.cdiv(rows, rpt),)
        if grid[0] >= 3:
            in_spec = pl.BlockSpec((rpt, lane_width), lambda i: (i, 0),
                                   pipeline_mode=pl.Buffered(3))
        else:
            in_spec = pl.BlockSpec((rpt, lane_width), lambda i: (i, 0))
        out2d = pl.pallas_call(
            kernel,
            out_shape=jax.ShapeDtypeStruct((rows, lane_width), dtype),
            grid_spec=pltpu.PrefetchScalarGridSpec(
                num_scalar_prefetch=0,
                grid=grid,
                in_specs=[in_spec],
                out_specs=pl.BlockSpec((rpt, lane_width), lambda i: (i, 0)),
            ),
            compiler_params=compiler_params,
        )(x2d)
        return out2d.reshape(orig_shape)

    # ---- rare ragged path (size not a multiple of 128): no pad/slice copies ----
    # Flat view processed as (1, total); 128-wide blocks, Pallas masks the ragged
    # tail on writeback (harmless for a pure elementwise op).
    x2d = jnp.reshape(x, (1, total))
    if total < LANES:
        chunk = total                               # full-extent block (legal)
    else:
        chunk = min(RAGGED_CHUNK, (total // LANES) * LANES)
    grid = (pl.cdiv(total, chunk),)
    out2d = pl.pallas_call(
        kernel,
        out_shape=jax.ShapeDtypeStruct((1, total), dtype),
        grid_spec=pltpu.PrefetchScalarGridSpec(
            num_scalar_prefetch=0,
            grid=grid,
            in_specs=[pl.BlockSpec((1, chunk), lambda i: (0, i))],
            out_specs=pl.BlockSpec((1, chunk), lambda i: (0, i)),
        ),
        compiler_params=compiler_params,
    )(x2d)
    return out2d.reshape(orig_shape)


def _ref_gelu(x, version):
    xf = x.astype(jnp.float32)
    if version == "v1":
        out = 0.5 * xf * (1.0 + jax.lax.erf(xf * jnp.float32(_INV_SQRT2)))
    else:
        out = xf * jax.nn.sigmoid(jnp.float32(1.702) * xf)
    return out.astype(x.dtype)


if __name__ == "__main__":
    key = jax.random.PRNGKey(0)
    ok = True

    # Primary case: NCHW-style f32 activations (lane-divisible main path).
    x = jax.random.normal(key, (2, 4, 16, 16), dtype=jnp.float32)
    for version in ("v1", "v2"):
        out = jax.block_until_ready(gelu_pallas(x, version=version))
        ref = _ref_gelu(x, version)
        ok &= bool(jnp.allclose(out, ref, atol=2e-5, rtol=2e-5))

    # Ragged (non-128-divisible) shapes exercise the masked (1, total) path.
    k1, k2, k3 = jax.random.split(key, 3)
    x_odd = jax.random.normal(k1, (3, 5, 7), dtype=jnp.float32)      # < 128 elems
    out = jax.block_until_ready(gelu_pallas(x_odd, version="v1"))
    ok &= bool(jnp.allclose(out, _ref_gelu(x_odd, "v1"), atol=2e-5, rtol=2e-5))

    x_odd2 = jax.random.normal(k2, (5, 37), dtype=jnp.float32)        # multi-block ragged
    out = jax.block_until_ready(gelu_pallas(x_odd2, version="v2"))
    ok &= bool(jnp.allclose(out, _ref_gelu(x_odd2, "v2"), atol=2e-5, rtol=2e-5))

    # bf16 path (f32 math inside the kernel, cast on store).
    x_bf16 = jax.random.normal(k3, (2, 8, 32), dtype=jnp.bfloat16)
    for version in ("v1", "v2"):
        out = jax.block_until_ready(gelu_pallas(x_bf16, version=version))
        ref = _ref_gelu(x_bf16, version)
        ok &= bool(jnp.allclose(out.astype(jnp.float32), ref.astype(jnp.float32),
                                atol=2e-2, rtol=2e-2))

    if ok:
        print("KERNEL_OK")
    else:
        print("KERNEL_MISMATCH")
</pallas_src>

<mosaic_0001>
module attributes {stable_mosaic.version = 11 : i64} {
  func.func @_gelu_v1_kernel(%arg0: i32, %arg1: memref<2x1024xf32, #tpu.memory_space<vmem>>, %arg2: memref<2x1024xf32, #tpu.memory_space<vmem>>) attributes {dimension_semantics = [#tpu.dimension_semantics<parallel>], iteration_bounds = array<i64: 1>, scalar_prefetch = 0 : i64, scratch_operands = 0 : i64, tpu.core_type = #tpu.core_type<tc>, window_params = [{transform_indices = @transform_0, window_bounds = array<i64: 2, 1024>}, {transform_indices = @transform_1, window_bounds = array<i64: 2, 1024>}]} {
    %c0 = arith.constant 0 : index
    %c0_0 = arith.constant 0 : index
    %0 = vector.load %arg1[%c0, %c0_0] : memref<2x1024xf32, #tpu.memory_space<vmem>>, vector<2x1024xf32>
    %cst = arith.constant 5.000000e-01 : f32
    %1 = vector.broadcast %cst : f32 to vector<2x1024xf32>
    %2 = arith.mulf %1, %0 : vector<2x1024xf32>
    %cst_1 = arith.constant 0.707106769 : f32
    %3 = vector.broadcast %cst_1 : f32 to vector<2x1024xf32>
    %4 = arith.mulf %0, %3 : vector<2x1024xf32>
    %5 = math.erf %4 : vector<2x1024xf32>
    %cst_2 = arith.constant 1.000000e+00 : f32
    %6 = vector.broadcast %cst_2 : f32 to vector<2x1024xf32>
    %7 = arith.addf %6, %5 : vector<2x1024xf32>
    %8 = arith.mulf %2, %7 : vector<2x1024xf32>
    %c0_3 = arith.constant 0 : index
    %c0_4 = arith.constant 0 : index
    %9 = vector.load %arg2[%c0_3, %c0_4] : memref<2x1024xf32, #tpu.memory_space<vmem>>, vector<2x1024xf32>
    tpu.vector_store %arg2[%c0_3, %c0_4], %8 {strides = array<i32>} : memref<2x1024xf32, #tpu.memory_space<vmem>>, vector<2x1024xf32>,
    return
  }
  func.func @transform_0(%arg0: i32) -> (i32, i32) {
    %c0_i32 = arith.constant 0 : i32
    %c0_i32_0 = arith.constant 0 : i32
    return %arg0, %c0_i32 : i32, i32
  }
  func.func @transform_1(%arg0: i32) -> (i32, i32) {
    %c0_i32 = arith.constant 0 : i32
    %c0_i32_0 = arith.constant 0 : i32
    return %arg0, %c0_i32 : i32, i32
  }
}

</mosaic_0001>

<bundles_post_ra>
// kernel: tpu_custom_call.1
= control target key start
LH: loop header
LB: loop body
LE: loop exit
PB: predicated region body
PF: predicated region fallthrough
CT: control target
= control target key end

     0   :  { %6 = vsyncpa [#allocation3], 0  ;;  %s228_s0 = inlined_call_operand.hbm [shape: f32[2,1024], index: 0, kind: input, shape index: {}]   ;;  %s229_s1 = inlined_call_operand.hbm [shape: f32[2,1024], index: 1, kind: output, shape index: {}]  }
   0x1   :  { %7 = vsyncpa [#allocation4], 0  ;;  %s13_s8 = sshll.u32 %s228_s0, 4  ;;  %s192_s9 = smov [#allocation2]   ;;  %s14_s8 = int_to_ptr.hbm [resolvable:$true] %s13_s8 }
   0x2   :  { %s15_s10 = sshll.u32 %s192_s9, 4  ;;  %s16_s10 = int_to_ptr.vmem [resolvable:$true] %s15_s10 }
   0x3   :  { %18 = dma.hbm_to_vmem [thread:$0]  %s14_s8, 256, %s16_s10, [#allocation3]  }
   0x4   :  { %188 = dma.done.wait [#allocation3], 256  }
   0x5   :  { %189 = vsyncadd [#allocation3], 4294967040  ;;  %v207_v0 = vld [vmem:[#allocation2] sm:$0xff]  ;;  %v209_v1 = vld [vmem:[#allocation2 + $0x8] sm:$0xff]  ;;  %s193_s0 = smov [#allocation5]   ;;  %s122_s14 = sshll.u32 %s229_s1, 4  ;;  %s123_s14 = int_to_ptr.hbm [resolvable:$true] %s122_s14 }
   0x6   :  { %v212_v2 = vmul.f32 0.70710677, %v207_v0  ;;  %v215_v3 = vmul.f32 0.70710677, %v209_v1  ;;  %s120_s11 = sshll.u32 %s193_s0, 4  ;;  %s121_s11 = int_to_ptr.vmem [resolvable:$true] %s120_s11 }
   0x8   :  { %v29_v4 = vmul.f32 %v212_v2, %v212_v2  ;;  %v69_v5 = vmul.f32 %v215_v3, %v215_v3 }
   0xa   :  { %v30_v6 = vmin.f32 %v29_v4, 16.0  ;;  %v70_v7 = vmin.f32 %v69_v5, 16.0 }
   0xc   :  { %v31_v8 = vmul.f32 2.1237322e-06, %v30_v6  ;;  %v42_v9 = vmul.f32 3.8918573e-05, %v30_v6  ;;  %v71_v10 = vmul.f32 2.1237322e-06, %v70_v7 }
   0xd   :  { %v82_v11 = vmul.f32 3.8918573e-05, %v70_v7 }
   0xe   :  { %v32_v12 = vadd.f32 0.00028619796, %v31_v8  ;;  %v43_v13 = vadd.f32 0.001143296, %v42_v9  ;;  %v72_v14 = vadd.f32 0.00028619796, %v71_v10 }
   0xf   :  { %v83_v15 = vadd.f32 0.001143296, %v82_v11 }
  0x10   :  { %v33_v16 = vmul.f32 %v32_v12, %v30_v6  ;;  %v44_v17 = vmul.f32 %v43_v13, %v30_v6  ;;  %v73_v18 = vmul.f32 %v72_v14, %v70_v7  ;;  %v25_v12 = vmul.f32 0.5, %v207_v0 }
  0x11   :  { %v84_v19 = vmul.f32 %v83_v15, %v70_v7  ;;  %v26_v14 = vmul.f32 0.5, %v209_v1 }
  0x12   :  { %v34_v20 = vadd.f32 0.0036580483, %v33_v16  ;;  %v45_v21 = vadd.f32 0.014752088, %v44_v17  ;;  %v74_v22 = vadd.f32 0.0036580483, %v73_v18 }
  0x13   :  { %v85_v23 = vadd.f32 0.014752088, %v84_v19 }
  0x14   :  { %v35_v24 = vmul.f32 %v34_v20, %v30_v6  ;;  %v46_v25 = vmul.f32 %v45_v21, %v30_v6  ;;  %v75_v26 = vmul.f32 %v74_v22, %v70_v7 }
  0x15   :  { %v86_v27 = vmul.f32 %v85_v23, %v70_v7 }
  0x16   :  { %v47_v28 = vadd.f32 0.112945676, %v46_v25  ;;  %v36_v29 = vadd.f32 0.05243302, %v35_v24  ;;  %v76_v32 = vadd.f32 0.05243302, %v75_v26 }
  0x17   :  { %v87_v30 = vadd.f32 0.112945676, %v86_v27 }
  0x18   :  { %v48_v31 = vmul.f32 %v47_v28, %v30_v6  ;;  %v37_v35 = vmul.f32 %v36_v29, %v30_v6  ;;  %v77_v38 = vmul.f32 %v76_v32, %v70_v7 }
  0x19   :  { %v88_v33 = vmul.f32 %v87_v30, %v70_v7 }
  0x1a   :  { %v49_v34 = vadd.f32 0.4994258, %v48_v31  ;;  %v38_v41 = vadd.f32 0.18741608, %v37_v35  ;;  %v78_v43 = vadd.f32 0.18741608, %v77_v38 }
  0x1b   :  { %v89_v36 = vadd.f32 0.4994258, %v88_v33 }
  0x1c   :  { %v50_v37 = vmul.f32 %v49_v34, %v30_v6  ;;  %v39_v44 = vmul.f32 %v38_v41, %v30_v6  ;;  %v79_v45 = vmul.f32 %v78_v43, %v70_v7 }
  0x1d   :  { %v90_v39 = vmul.f32 %v89_v36, %v70_v7 }
  0x1e   :  { %v51_v40 = vadd.f32 1.0, %v50_v37  ;;  %v40_v48 = vadd.f32 1.1283791, %v39_v44  ;;  %v80_v51 = vadd.f32 1.1283791, %v79_v45 }
  0x1f   :  { %v91_v42 = vadd.f32 1.0, %v90_v39 }
  0x20   :  { %136 = vrcp.f32 %v51_v40  ;;  %vm57_vm0 = vweird.f32 %v51_v40  ;;  %v63_v50 = vand.u32 2147483648, %v51_v40  ;;  %v61_v54 = vand.u32 2147483647, %v51_v40 }
  0x21   :  { %138 = vrcp.f32 %v91_v42  ;;  %v103_v55 = vand.u32 2147483648, %v91_v42  ;;  %vm97_vm2 = vweird.f32 %v91_v42  ;;  %v101_v57 = vand.u32 2147483647, %v91_v42 }
  0x22   :  { %v64_v59 = vor.u32 1.1754944e-38, %v63_v50  ;;  %v41_v61 = vmul.f32 %v40_v48, %v212_v2  ;;  %vm62_vm5 = vcmp.eq.f32.partialorder %v61_v54, 8.507059e+37  ;;  %v81_v4 = vmul.f32 %v80_v51, %v215_v3 }
  0x23   :  { %v104_v63 = vor.u32 1.1754944e-38, %v103_v55  ;;  %vm102_vm7 = vcmp.eq.f32.partialorder %v101_v57, 8.507059e+37 }
  0x26   :  { %v137_v46 = vpop.eup %136 }
  0x27   :  { %v139_v47 = vpop.eup %138  ;;  %v53_v49 = vmul.f32 %v137_v46, %v51_v40  ;;  %vm58_vm1 = vweird.f32 %v137_v46 }
  0x28   :  { %v93_v52 = vmul.f32 %v139_v47, %v91_v42  ;;  %vm98_vm3 = vweird.f32 %v139_v47  ;;  %vm59_vm4 = vmor %vm57_vm0, %vm58_vm1 }
  0x29   :  { %v54_v53 = vsub.f32 1.0, %v53_v49  ;;  %vm99_vm6 = vmor %vm97_vm2, %vm98_vm3 }
  0x2a   :  { %v94_v56 = vsub.f32 1.0, %v93_v52 }
  0x2b   :  { %v55_v58 = vmul.f32 %v137_v46, %v54_v53 }
  0x2c   :  { %v95_v60 = vmul.f32 %v139_v47, %v94_v56 }
  0x2d   :  { %v56_v62 = vadd.f32 %v137_v46, %v55_v58 }
  0x2e   :  { %v96_v5 = vadd.f32 %v139_v47, %v95_v60 }
  0x2f   :  { %v60_v6 = vsel %vm59_vm4, %v137_v46, %v56_v62 }
  0x30   :  { %v65_v7 = vsel %vm62_vm5, %v64_v59, %v60_v6  ;;  %v100_v8 = vsel %vm99_vm6, %v139_v47, %v96_v5 }
  0x31   :  { %v66_v9 = vmul.f32 %v65_v7, %v41_v61  ;;  %v105_v10 = vsel %vm102_vm7, %v104_v63, %v100_v8 }
  0x32   :  { %v106_v11 = vmul.f32 %v105_v10, %v81_v4 }
  0x33   :  { %v132_v13 = vclamps-f32 %v66_v9, 1.0 }
  0x34   :  { %v133_v2 = vclamps-f32 %v106_v11, 1.0 }
  0x35   :  { %v109_v15 = vadd.f32 1.0, %v132_v13 }
  0x36   :  { %v110_v3 = vadd.f32 1.0, %v133_v2 }
  0x37   :  { %v111_v16 = vmul.f32 %v109_v15, %v25_v12 }
  0x38   :  { %v112_v17 = vmul.f32 %v110_v3, %v26_v14 }
  0x39   :  { %113 = vst [vmem:[#allocation5] sm:$0xff] %v111_v16 }
  0x3a   :  { %114 = vst [vmem:[#allocation5 + $0x8] sm:$0xff] %v112_v17 }
  0x3b   :  { %125 = dma.vmem_to_hbm [thread:$0]  %s121_s11, 256, %s123_s14, [#allocation4]  }
  0x3c   :  { %190 = dma.done.wait [#allocation4], 256  }
  0x3d   :  { %191 = vsyncadd [#allocation4], 4294967040 }
  0x3e   :  { %130 = vsyncpa [#allocation3], 1 }
  0x3f   :  { %131 = vsyncpa [#allocation4], 1 }

</bundles_post_ra>
